<compile_context>
chip_gen: v7x
topology: tpu7x:2x2x1
jax: 0.10.0
libtpu: 0.0.40
codegen_flags: <defaults>
</compile_context>

<pallas_src>
import math
from functools import partial

import jax
import jax.numpy as jnp
from jax.experimental import pallas as pl
from jax.experimental.pallas import tpu as pltpu


# ---------------------------------------------------------------------------
# Kernel: conv (circular pad) + BN(eval) + ELU + maxpool, TB batch rows / step
# ---------------------------------------------------------------------------

def _conv_layer_kernel(x_ref, w_taps_ref, shift_ref, sel_ref, out_ref, *,
                       tb, seq_len):
    L = seq_len
    L_c = L + 2                       # conv output length (circular pad = 2)

    for i in range(tb):               # static unroll over rows in this block
        x = x_ref[i]                                              # (L, C)

        # --- circular padding=2 along time (== F.pad(..., mode='circular')) --
        xp = jnp.concatenate([x[L - 2:L, :], x, x[0:2, :]], axis=0)   # (L+4, C)

        # --- Conv1d(k=3) as 3 shifted matmuls; BN scale folded into taps -----
        y = jnp.dot(xp[0:L_c, :], w_taps_ref[0],
                    preferred_element_type=jnp.float32)
        y = y + jnp.dot(xp[1:L_c + 1, :], w_taps_ref[1],
                        preferred_element_type=jnp.float32)
        y = y + jnp.dot(xp[2:L_c + 2, :], w_taps_ref[2],
                        preferred_element_type=jnp.float32)
        y = y + shift_ref[...]                                    # (L_c, C)

        # --- ELU (alpha = 1) --------------------------------------------------
        y = jnp.where(y > 0.0, y, jnp.exp(jnp.minimum(y, 0.0)) - 1.0)

        # --- MaxPool1d(kernel=3, stride=2, padding=1) -------------------------
        # Edge-replicate pad (equivalent to -inf pad for max), running max of 3
        # shifted contiguous slices, then pick even positions via a selection
        # matmul on the MXU (no strided / XLU gathers).
        y_pad = jnp.concatenate([y[0:1, :], y, y[L_c - 1:L_c, :]], axis=0)
        fm = jnp.maximum(jnp.maximum(y_pad[0:L_c, :], y_pad[1:L_c + 1, :]),
                         y_pad[2:L_c + 2, :])                     # (L_c, C)
        out_ref[i] = jnp.dot(sel_ref[...], fm,
                             preferred_element_type=jnp.float32)  # (L_p, C)


# ---------------------------------------------------------------------------
# Wrapper
# ---------------------------------------------------------------------------

def conv_layer_forward(x, params, *, eps=1e-5, rows_per_step=8):
    """x: (B, L, C) float32  ->  (B, (L+1)//2 + 1, C) float32."""
    B, L, C = x.shape
    L_c = L + 2
    L_p = (L_c - 1) // 2 + 1          # MaxPool1d(k=3, s=2, p=1) output length

    # --- fold BatchNorm (eval) + conv bias into weights / shift (host side) --
    w = params["conv_w"]                                   # (C_out, C_in, 3)
    b = params["conv_b"]                                   # (C,)
    scale = params["bn_gamma"] / jnp.sqrt(params["bn_var"] + eps)   # (C,)
    shift = (b - params["bn_mean"]) * scale + params["bn_beta"]     # (C,)
    # tap-k dense weight (C_in, C_out), output-channel BN scale folded in
    w_taps = jnp.stack([w[:, :, k].T * scale[None, :] for k in range(3)],
                       axis=0).astype(jnp.float32)         # (3, C, C)
    shift = shift.reshape(1, C).astype(jnp.float32)

    # stride-2 downsample as a (L_p, L_c) 0/1 selection matrix
    sel = (jnp.arange(L_c)[None, :] ==
           2 * jnp.arange(L_p)[:, None]).astype(jnp.float32)

    # rows per grid step (largest divisor of B not exceeding rows_per_step)
    tb = min(rows_per_step, B)
    while B % tb != 0:
        tb -= 1

    in_specs = [
        pl.BlockSpec((tb, L, C), lambda i: (i, 0, 0)),     # activations
        pl.BlockSpec((3, C, C), lambda i: (0, 0, 0)),      # folded conv taps
        pl.BlockSpec((1, C), lambda i: (0, 0)),            # folded bias/shift
        pl.BlockSpec((L_p, L_c), lambda i: (0, 0)),        # pool selection
    ]
    out_specs = pl.BlockSpec((tb, L_p, C), lambda i: (i, 0, 0))

    return pl.pallas_call(
        partial(_conv_layer_kernel, tb=tb, seq_len=L),
        out_shape=jax.ShapeDtypeStruct((B, L_p, C), jnp.float32),
        grid=(B // tb,),
        in_specs=in_specs,
        out_specs=out_specs,
        compiler_params=pltpu.CompilerParams(dimension_semantics=("parallel",)),
    )(x.astype(jnp.float32), w_taps, shift, sel)


class ConvLayer:
    """Mirrors the PyTorch ConvLayer forward (inference semantics)."""

    def __init__(self, params, *, eps=1e-5):
        self.params = params
        self.eps = eps

    def __call__(self, x):
        return conv_layer_forward(x, self.params, eps=self.eps)


# ---------------------------------------------------------------------------
# Deterministic parameter init (PyTorch-layout params)
# ---------------------------------------------------------------------------

def init_conv_layer_params(key, c_in):
    k_w, k_b, k_g, k_be, k_m, k_v = jax.random.split(key, 6)
    s = 1.0 / math.sqrt(c_in * 3)     # Conv1d default init bound
    return {
        "conv_w": jax.random.uniform(k_w, (c_in, c_in, 3), jnp.float32, -s, s),
        "conv_b": jax.random.uniform(k_b, (c_in,), jnp.float32, -s, s),
        "bn_gamma": jax.random.uniform(k_g, (c_in,), jnp.float32, 0.5, 1.5),
        "bn_beta": jax.random.uniform(k_be, (c_in,), jnp.float32, -0.5, 0.5),
        "bn_mean": jax.random.uniform(k_m, (c_in,), jnp.float32, -0.5, 0.5),
        "bn_var": jax.random.uniform(k_v, (c_in,), jnp.float32, 0.5, 1.5),
    }


if __name__ == "__main__":
    B, L, C = 2, 8, 32                # batch, seq_len, c_in (d_model)

    key = jax.random.PRNGKey(0)
    key_x, key_p = jax.random.split(key)

    x = jax.random.normal(key_x, (B, L, C), jnp.float32)
    layer = ConvLayer(init_conv_layer_params(key_p, C))

    out = layer(x)
    jax.block_until_ready(out)

    L_p = (L + 2 + 2 - 3) // 2 + 1    # expected MaxPool1d output length
    assert out.shape == (B, L_p, C), out.shape
    assert bool(jnp.all(jnp.isfinite(out)))
    print("KERNEL_OK")
</pallas_src>

<mosaic_0001>
module attributes {stable_mosaic.version = 11 : i64} {
  func.func @_conv_layer_kernel(%arg0: i32, %arg1: memref<2x8x32xf32, #tpu.memory_space<vmem>>, %arg2: memref<3x32x32xf32, #tpu.memory_space<vmem>>, %arg3: memref<1x32xf32, #tpu.memory_space<vmem>>, %arg4: memref<5x10xf32, #tpu.memory_space<vmem>>, %arg5: memref<2x5x32xf32, #tpu.memory_space<vmem>>) attributes {dimension_semantics = [#tpu.dimension_semantics<parallel>], iteration_bounds = array<i64: 1>, scalar_prefetch = 0 : i64, scratch_operands = 0 : i64, tpu.core_type = #tpu.core_type<tc>, window_params = [{transform_indices = @transform_0, window_bounds = array<i64: 2, 8, 32>}, {pipeline_mode = #tpu.pipeline_mode<synchronous>, transform_indices = @transform_1, window_bounds = array<i64: 3, 32, 32>}, {pipeline_mode = #tpu.pipeline_mode<synchronous>, transform_indices = @transform_2, window_bounds = array<i64: 1, 32>}, {pipeline_mode = #tpu.pipeline_mode<synchronous>, transform_indices = @transform_3, window_bounds = array<i64: 5, 10>}, {transform_indices = @transform_4, window_bounds = array<i64: 2, 5, 32>}]} {
    %c0 = arith.constant 0 : index
    %c0_0 = arith.constant 0 : index
    %c0_1 = arith.constant 0 : index
    %0 = vector.load %arg1[%c0, %c0_0, %c0_1] : memref<2x8x32xf32, #tpu.memory_space<vmem>>, vector<1x8x32xf32>
    %1 = vector.shape_cast %0 : vector<1x8x32xf32> to vector<8x32xf32>
    %2 = vector.extract_strided_slice %1 {offsets = [6, 0], sizes = [2, 32], strides = [1, 1]} : vector<8x32xf32> to vector<2x32xf32>
    %3 = vector.extract_strided_slice %1 {offsets = [0, 0], sizes = [2, 32], strides = [1, 1]} : vector<8x32xf32> to vector<2x32xf32>
    %4 = tpu.concatenate %2, %1, %3 in 0 : vector<2x32xf32>, vector<8x32xf32>, vector<2x32xf32> -> vector<12x32xf32>
    %5 = vector.extract_strided_slice %4 {offsets = [0, 0], sizes = [10, 32], strides = [1, 1]} : vector<12x32xf32> to vector<10x32xf32>
    %c0_2 = arith.constant 0 : index
    %c0_3 = arith.constant 0 : index
    %c0_4 = arith.constant 0 : index
    %6 = vector.load %arg2[%c0_2, %c0_3, %c0_4] : memref<3x32x32xf32, #tpu.memory_space<vmem>>, vector<1x32x32xf32>
    %7 = vector.shape_cast %6 : vector<1x32x32xf32> to vector<32x32xf32>
    %cst = arith.constant dense<0.000000e+00> : vector<10x32xf32>
    %8 = tpu.matmul %5, %7, %cst {dimension_numbers = #tpu.dot_dimension_numbers<[1], [0], [0], [1], [0, 0, 1, 1], [], []>} : vector<10x32xf32>, vector<32x32xf32>, vector<10x32xf32> -> vector<10x32xf32>
    %9 = vector.extract_strided_slice %4 {offsets = [1, 0], sizes = [10, 32], strides = [1, 1]} : vector<12x32xf32> to vector<10x32xf32>
    %c1 = arith.constant 1 : index
    %c0_5 = arith.constant 0 : index
    %c0_6 = arith.constant 0 : index
    %10 = vector.load %arg2[%c1, %c0_5, %c0_6] : memref<3x32x32xf32, #tpu.memory_space<vmem>>, vector<1x32x32xf32>
    %11 = vector.shape_cast %10 : vector<1x32x32xf32> to vector<32x32xf32>
    %cst_7 = arith.constant dense<0.000000e+00> : vector<10x32xf32>
    %12 = tpu.matmul %9, %11, %cst_7 {dimension_numbers = #tpu.dot_dimension_numbers<[1], [0], [0], [1], [0, 0, 1, 1], [], []>} : vector<10x32xf32>, vector<32x32xf32>, vector<10x32xf32> -> vector<10x32xf32>
    %13 = arith.addf %8, %12 : vector<10x32xf32>
    %14 = vector.extract_strided_slice %4 {offsets = [2, 0], sizes = [10, 32], strides = [1, 1]} : vector<12x32xf32> to vector<10x32xf32>
    %c2 = arith.constant 2 : index
    %c0_8 = arith.constant 0 : index
    %c0_9 = arith.constant 0 : index
    %15 = vector.load %arg2[%c2, %c0_8, %c0_9] : memref<3x32x32xf32, #tpu.memory_space<vmem>>, vector<1x32x32xf32>
    %16 = vector.shape_cast %15 : vector<1x32x32xf32> to vector<32x32xf32>
    %cst_10 = arith.constant dense<0.000000e+00> : vector<10x32xf32>
    %17 = tpu.matmul %14, %16, %cst_10 {dimension_numbers = #tpu.dot_dimension_numbers<[1], [0], [0], [1], [0, 0, 1, 1], [], []>} : vector<10x32xf32>, vector<32x32xf32>, vector<10x32xf32> -> vector<10x32xf32>
    %18 = arith.addf %13, %17 : vector<10x32xf32>
    %c0_11 = arith.constant 0 : index
    %c0_12 = arith.constant 0 : index
    %19 = vector.load %arg3[%c0_11, %c0_12] : memref<1x32xf32, #tpu.memory_space<vmem>>, vector<1x32xf32>
    %20 = vector.broadcast %19 : vector<1x32xf32> to vector<10x32xf32>
    %21 = arith.addf %18, %20 : vector<10x32xf32>
    %cst_13 = arith.constant 0.000000e+00 : f32
    %22 = vector.broadcast %cst_13 : f32 to vector<10x32xf32>
    %23 = arith.cmpf ogt, %21, %22 : vector<10x32xf32>
    %cst_14 = arith.constant 0.000000e+00 : f32
    %24 = vector.broadcast %cst_14 : f32 to vector<10x32xf32>
    %25 = arith.minimumf %21, %24 : vector<10x32xf32>
    %26 = math.exp %25 : vector<10x32xf32>
    %cst_15 = arith.constant 1.000000e+00 : f32
    %27 = vector.broadcast %cst_15 : f32 to vector<10x32xf32>
    %28 = arith.subf %26, %27 : vector<10x32xf32>
    %29 = arith.select %23, %21, %28 : vector<10x32xi1>, vector<10x32xf32>
    %30 = vector.extract_strided_slice %29 {offsets = [0, 0], sizes = [1, 32], strides = [1, 1]} : vector<10x32xf32> to vector<1x32xf32>
    %31 = vector.extract_strided_slice %29 {offsets = [9, 0], sizes = [1, 32], strides = [1, 1]} : vector<10x32xf32> to vector<1x32xf32>
    %32 = tpu.concatenate %30, %29, %31 in 0 : vector<1x32xf32>, vector<10x32xf32>, vector<1x32xf32> -> vector<12x32xf32>
    %33 = vector.extract_strided_slice %32 {offsets = [0, 0], sizes = [10, 32], strides = [1, 1]} : vector<12x32xf32> to vector<10x32xf32>
    %34 = vector.extract_strided_slice %32 {offsets = [1, 0], sizes = [10, 32], strides = [1, 1]} : vector<12x32xf32> to vector<10x32xf32>
    %35 = arith.maximumf %33, %34 : vector<10x32xf32>
    %36 = vector.extract_strided_slice %32 {offsets = [2, 0], sizes = [10, 32], strides = [1, 1]} : vector<12x32xf32> to vector<10x32xf32>
    %37 = arith.maximumf %35, %36 : vector<10x32xf32>
    %c0_16 = arith.constant 0 : index
    %c0_17 = arith.constant 0 : index
    %38 = vector.load %arg4[%c0_16, %c0_17] : memref<5x10xf32, #tpu.memory_space<vmem>>, vector<5x10xf32>
    %cst_18 = arith.constant dense<0.000000e+00> : vector<5x32xf32>
    %39 = tpu.matmul %38, %37, %cst_18 {dimension_numbers = #tpu.dot_dimension_numbers<[1], [0], [0], [1], [0, 0, 1, 1], [], []>} : vector<5x10xf32>, vector<10x32xf32>, vector<5x32xf32> -> vector<5x32xf32>
    %c0_19 = arith.constant 0 : index
    %c0_20 = arith.constant 0 : index
    %c0_21 = arith.constant 0 : index
    %40 = vector.load %arg5[%c0_19, %c0_20, %c0_21] : memref<2x5x32xf32, #tpu.memory_space<vmem>>, vector<1x5x32xf32>
    %41 = vector.shape_cast %40 : vector<1x5x32xf32> to vector<5x32xf32>
    %42 = vector.shape_cast %39 : vector<5x32xf32> to vector<1x5x32xf32>
    tpu.vector_store %arg5[%c0_19, %c0_20, %c0_21], %42 {strides = array<i32>} : memref<2x5x32xf32, #tpu.memory_space<vmem>>, vector<1x5x32xf32>,
    %c1_22 = arith.constant 1 : index
    %c0_23 = arith.constant 0 : index
    %c0_24 = arith.constant 0 : index
    %43 = vector.load %arg1[%c1_22, %c0_23, %c0_24] : memref<2x8x32xf32, #tpu.memory_space<vmem>>, vector<1x8x32xf32>
    %44 = vector.shape_cast %43 : vector<1x8x32xf32> to vector<8x32xf32>
    %45 = vector.extract_strided_slice %44 {offsets = [6, 0], sizes = [2, 32], strides = [1, 1]} : vector<8x32xf32> to vector<2x32xf32>
    %46 = vector.extract_strided_slice %44 {offsets = [0, 0], sizes = [2, 32], strides = [1, 1]} : vector<8x32xf32> to vector<2x32xf32>
    %47 = tpu.concatenate %45, %44, %46 in 0 : vector<2x32xf32>, vector<8x32xf32>, vector<2x32xf32> -> vector<12x32xf32>
    %48 = vector.extract_strided_slice %47 {offsets = [0, 0], sizes = [10, 32], strides = [1, 1]} : vector<12x32xf32> to vector<10x32xf32>
    %c0_25 = arith.constant 0 : index
    %c0_26 = arith.constant 0 : index
    %c0_27 = arith.constant 0 : index
    %49 = vector.load %arg2[%c0_25, %c0_26, %c0_27] : memref<3x32x32xf32, #tpu.memory_space<vmem>>, vector<1x32x32xf32>
    %50 = vector.shape_cast %49 : vector<1x32x32xf32> to vector<32x32xf32>
    %cst_28 = arith.constant dense<0.000000e+00> : vector<10x32xf32>
    %51 = tpu.matmul %48, %50, %cst_28 {dimension_numbers = #tpu.dot_dimension_numbers<[1], [0], [0], [1], [0, 0, 1, 1], [], []>} : vector<10x32xf32>, vector<32x32xf32>, vector<10x32xf32> -> vector<10x32xf32>
    %52 = vector.extract_strided_slice %47 {offsets = [1, 0], sizes = [10, 32], strides = [1, 1]} : vector<12x32xf32> to vector<10x32xf32>
    %c1_29 = arith.constant 1 : index
    %c0_30 = arith.constant 0 : index
    %c0_31 = arith.constant 0 : index
    %53 = vector.load %arg2[%c1_29, %c0_30, %c0_31] : memref<3x32x32xf32, #tpu.memory_space<vmem>>, vector<1x32x32xf32>
    %54 = vector.shape_cast %53 : vector<1x32x32xf32> to vector<32x32xf32>
    %cst_32 = arith.constant dense<0.000000e+00> : vector<10x32xf32>
    %55 = tpu.matmul %52, %54, %cst_32 {dimension_numbers = #tpu.dot_dimension_numbers<[1], [0], [0], [1], [0, 0, 1, 1], [], []>} : vector<10x32xf32>, vector<32x32xf32>, vector<10x32xf32> -> vector<10x32xf32>
    %56 = arith.addf %51, %55 : vector<10x32xf32>
    %57 = vector.extract_strided_slice %47 {offsets = [2, 0], sizes = [10, 32], strides = [1, 1]} : vector<12x32xf32> to vector<10x32xf32>
    %c2_33 = arith.constant 2 : index
    %c0_34 = arith.constant 0 : index
    %c0_35 = arith.constant 0 : index
    %58 = vector.load %arg2[%c2_33, %c0_34, %c0_35] : memref<3x32x32xf32, #tpu.memory_space<vmem>>, vector<1x32x32xf32>
    %59 = vector.shape_cast %58 : vector<1x32x32xf32> to vector<32x32xf32>
    %cst_36 = arith.constant dense<0.000000e+00> : vector<10x32xf32>
    %60 = tpu.matmul %57, %59, %cst_36 {dimension_numbers = #tpu.dot_dimension_numbers<[1], [0], [0], [1], [0, 0, 1, 1], [], []>} : vector<10x32xf32>, vector<32x32xf32>, vector<10x32xf32> -> vector<10x32xf32>
    %61 = arith.addf %56, %60 : vector<10x32xf32>
    %c0_37 = arith.constant 0 : index
    %c0_38 = arith.constant 0 : index
    %62 = vector.load %arg3[%c0_37, %c0_38] : memref<1x32xf32, #tpu.memory_space<vmem>>, vector<1x32xf32>
    %63 = vector.broadcast %62 : vector<1x32xf32> to vector<10x32xf32>
    %64 = arith.addf %61, %63 : vector<10x32xf32>
    %cst_39 = arith.constant 0.000000e+00 : f32
    %65 = vector.broadcast %cst_39 : f32 to vector<10x32xf32>
    %66 = arith.cmpf ogt, %64, %65 : vector<10x32xf32>
    %cst_40 = arith.constant 0.000000e+00 : f32
    %67 = vector.broadcast %cst_40 : f32 to vector<10x32xf32>
    %68 = arith.minimumf %64, %67 : vector<10x32xf32>
    %69 = math.exp %68 : vector<10x32xf32>
    %cst_41 = arith.constant 1.000000e+00 : f32
    %70 = vector.broadcast %cst_41 : f32 to vector<10x32xf32>
    %71 = arith.subf %69, %70 : vector<10x32xf32>
    %72 = arith.select %66, %64, %71 : vector<10x32xi1>, vector<10x32xf32>
    %73 = vector.extract_strided_slice %72 {offsets = [0, 0], sizes = [1, 32], strides = [1, 1]} : vector<10x32xf32> to vector<1x32xf32>
    %74 = vector.extract_strided_slice %72 {offsets = [9, 0], sizes = [1, 32], strides = [1, 1]} : vector<10x32xf32> to vector<1x32xf32>
    %75 = tpu.concatenate %73, %72, %74 in 0 : vector<1x32xf32>, vector<10x32xf32>, vector<1x32xf32> -> vector<12x32xf32>
    %76 = vector.extract_strided_slice %75 {offsets = [0, 0], sizes = [10, 32], strides = [1, 1]} : vector<12x32xf32> to vector<10x32xf32>
    %77 = vector.extract_strided_slice %75 {offsets = [1, 0], sizes = [10, 32], strides = [1, 1]} : vector<12x32xf32> to vector<10x32xf32>
    %78 = arith.maximumf %76, %77 : vector<10x32xf32>
    %79 = vector.extract_strided_slice %75 {offsets = [2, 0], sizes = [10, 32], strides = [1, 1]} : vector<12x32xf32> to vector<10x32xf32>
    %80 = arith.maximumf %78, %79 : vector<10x32xf32>
    %c0_42 = arith.constant 0 : index
    %c0_43 = arith.constant 0 : index
    %81 = vector.load %arg4[%c0_42, %c0_43] : memref<5x10xf32, #tpu.memory_space<vmem>>, vector<5x10xf32>
    %cst_44 = arith.constant dense<0.000000e+00> : vector<5x32xf32>
    %82 = tpu.matmul %81, %80, %cst_44 {dimension_numbers = #tpu.dot_dimension_numbers<[1], [0], [0], [1], [0, 0, 1, 1], [], []>} : vector<5x10xf32>, vector<10x32xf32>, vector<5x32xf32> -> vector<5x32xf32>
    %c1_45 = arith.constant 1 : index
    %c0_46 = arith.constant 0 : index
    %c0_47 = arith.constant 0 : index
    %83 = vector.load %arg5[%c1_45, %c0_46, %c0_47] : memref<2x5x32xf32, #tpu.memory_space<vmem>>, vector<1x5x32xf32>
    %84 = vector.shape_cast %83 : vector<1x5x32xf32> to vector<5x32xf32>
    %85 = vector.shape_cast %82 : vector<5x32xf32> to vector<1x5x32xf32>
    tpu.vector_store %arg5[%c1_45, %c0_46, %c0_47], %85 {strides = array<i32>} : memref<2x5x32xf32, #tpu.memory_space<vmem>>, vector<1x5x32xf32>,
    return
  }
  func.func @transform_0(%arg0: i32) -> (i32, i32, i32) {
    %c0_i32 = arith.constant 0 : i32
    %c0_i32_0 = arith.constant 0 : i32
    %c0_i32_1 = arith.constant 0 : i32
    return %arg0, %c0_i32, %c0_i32_0 : i32, i32, i32
  }
  func.func @transform_1(%arg0: i32) -> (i32, i32, i32) {
    %c0_i32 = arith.constant 0 : i32
    %c0_i32_0 = arith.constant 0 : i32
    %c0_i32_1 = arith.constant 0 : i32
    %c0_i32_2 = arith.constant 0 : i32
    return %c0_i32, %c0_i32_0, %c0_i32_1 : i32, i32, i32
  }
  func.func @transform_2(%arg0: i32) -> (i32, i32) {
    %c0_i32 = arith.constant 0 : i32
    %c0_i32_0 = arith.constant 0 : i32
    %c0_i32_1 = arith.constant 0 : i32
    return %c0_i32, %c0_i32_0 : i32, i32
  }
  func.func @transform_3(%arg0: i32) -> (i32, i32) {
    %c0_i32 = arith.constant 0 : i32
    %c0_i32_0 = arith.constant 0 : i32
    %c0_i32_1 = arith.constant 0 : i32
    return %c0_i32, %c0_i32_0 : i32, i32
  }
  func.func @transform_4(%arg0: i32) -> (i32, i32, i32) {
    %c0_i32 = arith.constant 0 : i32
    %c0_i32_0 = arith.constant 0 : i32
    %c0_i32_1 = arith.constant 0 : i32
    return %arg0, %c0_i32, %c0_i32_0 : i32, i32, i32
  }
}

</mosaic_0001>

<bundles_post_ra>
// kernel: tpu_custom_call.1
= control target key start
LH: loop header
LB: loop body
LE: loop exit
PB: predicated region body
PF: predicated region fallthrough
CT: control target
= control target key end

     0   :  { %9 = vsyncpa [#allocation3], 0  ;;  %s1254_s0 = inlined_call_operand.hbm [shape: f32[2,8,32], index: 0, kind: input, shape index: {}]   ;;  %s1255_s1 = inlined_call_operand.hbm [shape: f32[3,32,32], index: 1, kind: input, shape index: {}]   ;;  %s1256_s2 = inlined_call_operand.vmem [shape: f32[1,32], index: 2, kind: input, shape index: {}]   ;;  %s1257_s3 = inlined_call_operand.vmem [shape: f32[5,10], index: 3, kind: input, shape index: {}]   ;;  %s1258_s4 = inlined_call_operand.vmem [shape: f32[2,5,32], index: 4, kind: output, shape index: {}]  }
   0x1   :  { %10 = vsyncpa [#allocation5], 0  ;;  %s1106_s15 = smov [#allocation2]   ;;  %s1058_s19 = scalar_lea.hbm %s1254_s0, 256 }
   0x2   :  { %s16_s16 = sshll.u32 %s1106_s15, 4  ;;  %p1059_p0 = scmp.ne.s32.totalorder %s1254_s0, %s1058_s19  ;;  %s17_s16 = int_to_ptr.vmem [resolvable:$true] %s16_s16 }
   0x3   :  { %p1062_p1 = scmp.lt.u32.totalorder %s1058_s19, %s1254_s0 }
   0x5   :  { %p1064_p2 = pnand %p1062_p1, %p1059_p0 }
   0x7   :  { %1067 = shalt.err (!%p1064_p2)
}
   0x8   :  { %s1068_s24 = scalar_lea.vmem %s17_s16, 256  ;;  %p1073_p4 = scmp.lt.s32.totalorder %s17_s16, %s17_s16 }
   0x9   :  { %p1069_p3 = scmp.ne.s32.totalorder %s17_s16, %s1068_s24  ;;  %p1074_p5 = scmp.lt.s32.totalorder %s1068_s24, %s1068_s24 }
   0xb   :  { %p1075_p6 = por %p1074_p5, %p1073_p4 }
   0xd   :  { %p1076_p7 = pnand %p1075_p6, %p1069_p3 }
   0xf   :  { %1079 = shalt.err (!%p1076_p7)
}
  0x10   :  { %s1107_s25 = smov 128   ;;  %s1108_s26 = smov 8  }
  0x11   :  { %22 = dma.hbm_to_vmem [thread:$0]  %s1254_s0, 256, %s17_s16, [#allocation3], %s1107_s25, %s1107_s25, %s1108_s26  }
  0x12   :  { %s1109_s29 = smov [#allocation4]   ;;  %s1080_s7 = scalar_lea.hbm %s1255_s1, 1536 }
  0x13   :  { %s28_s30 = sshll.u32 %s1109_s29, 4  ;;  %p1081_p8 = scmp.ne.s32.totalorder %s1255_s1, %s1080_s7  ;;  %s29_s30 = int_to_ptr.vmem [resolvable:$true] %s28_s30 }
  0x14   :  { %p1084_p9 = scmp.lt.u32.totalorder %s1080_s7, %s1255_s1 }
  0x16   :  { %p1086_p10 = pnand %p1084_p9, %p1081_p8 }
  0x18   :  { %1089 = shalt.err (!%p1086_p10)
}
  0x19   :  { %s1090_s12 = scalar_lea.vmem %s29_s30, 1536  ;;  %p1095_p12 = scmp.lt.s32.totalorder %s29_s30, %s29_s30 }
  0x1a   :  { %p1091_p11 = scmp.ne.s32.totalorder %s29_s30, %s1090_s12  ;;  %p1096_p13 = scmp.lt.s32.totalorder %s1090_s12, %s1090_s12 }
  0x1c   :  { %p1097_p0 = por %p1096_p13, %p1095_p12 }
  0x1e   :  { %p1098_p1 = pnand %p1097_p0, %p1091_p11 }
  0x20   :  { %1101 = shalt.err (!%p1098_p1)
}
  0x21   :  { %34 = dma.hbm_to_vmem [thread:$0]  %s1255_s1, 1536, %s29_s30, [#allocation5], %s1107_s25, %s1107_s25, %s1108_s26  }
  0x22   :  { %1102 = dma.done.wait [#allocation3], 256  }
  0x23   :  { %1103 = vsyncadd [#allocation3], 4294967040 }
  0x24   :  { %1104 = dma.done.wait [#allocation5], 1536  }
  0x25   :  { %1105 = vsyncadd [#allocation5], 4294965760  ;;  %v56_v0 = vld [vmem:[#allocation4 + $0x20] sm:$0xff]  ;;  %v57_v1 = vld [vmem:[#allocation4 + $0x28] sm:$0xff]  ;;  %vm64_vm0 = vcmask 261120   ;;  %v1110_v22 = vmov 0.0|0.0  }
  0x26   :  { %v58_v2 = vld [vmem:[#allocation4 + $0x30] sm:$0xff]  ;;  %v1163_v3 = vpack.c.bf16 %v57_v1, %v56_v0  ;;  %v59_v4 = vld [vmem:[#allocation4 + $0x38] sm:$0xff]  ;;  %v51_v8 = vld [vmem:[#allocation4] sm:$0xff]  ;;  %1002 = vmatprep.subr.bf16.mxu1 %v1110_v22  ;;  %vm1111_vm1 = vmmov 0   ;;  %v1112_v23 = vmov 0.0   ;;  %vm333_vm4 = vcmask 1040384  }
  0x27   :  { %v45_v5 = vld [vmem:[#allocation2] sm:$0xff]  ;;  %v1165_v6 = vpack.c.bf16 %v59_v4, %v58_v2  ;;  %v52_v9 = vld [vmem:[#allocation4 + $0x8] sm:$0xff]  ;;  %v54_v13 = vld [vmem:[#allocation4 + $0x18] sm:$0xff]  ;;  %935 = vmatprep.mubr.msk.f32.mxu1 %vm1111_vm1, %v1112_v23  ;;  %vm342_vm5 = vcmask 1042432   ;;  %vm61_vm6 = vcmask 1046528   ;;  %vm226_vm7 = vcmask 1045504  }
  0x28   :  { %v47_v7 = vrot.slane %v45_v5, 6  ;;  %979 = vmatprep.subr.bf16.mxu0 %v1163_v3  ;;  %v1170_v11 = vpack.c.bf16 %v52_v9, %v51_v8  ;;  %v53_v12 = vld [vmem:[#allocation4 + $0x10] sm:$0xff]  ;;  %v222_v15 = vld [vmem:[#allocation4 + $0x40] sm:$0xff]  ;;  %v223_v16 = vld [vmem:[#allocation4 + $0x48] sm:$0xff]  ;;  %vm49_vm8 = vcmask 1041408   ;;  %vm1113_vm9 = vmmov 1  }
  0x29   :  { %981 = vmatpush3.bf16.msra.mxu0 %v1163_v3  ;;  %v1175_v14 = vpack.c.bf16 %v54_v13, %v53_v12  ;;  %v1181_v17 = vpack.c.bf16 %v223_v16, %v222_v15  ;;  %v224_v18 = vld [vmem:[#allocation4 + $0x50] sm:$0xff]  ;;  %v225_v19 = vld [vmem:[#allocation4 + $0x58] sm:$0xff]  ;;  %v1196_v24 = vld [vmem:[%s1256_s2] ss:$0 sm:$0xff]  ;;  %vm361_vm11 = vcmask 80896   ;;  %vm438_vm12 = vcmask 258048  }
  0x2a   :  { %v62_v10 = vrot.slane %v47_v7, 1  ;;  %983 = vmatprep.subr.bf16.mxu0 %v1165_v6  ;;  %v227_v20 = vrot.slane %v47_v7, 2  ;;  %v1185_v21 = vpack.c.bf16 %v225_v19, %v224_v18  ;;  %v441_v52 = vld [vmem:[#allocation2 + $0x8] sm:$0xff]  ;;  %vm1205_vm10 = vmpackc.low %vm49_vm8, %vm1113_vm9  ;;  %v360_v59 = vld [vmem:[%s1257_s3] sm:$0x1f] }
  0x2b   :  { %v443_v56 = vrot.slane %v441_v52, 6 }
  0x2c   :  { %906 = vmatprep.mubr.msk.f32.mxu0 %vm64_vm0, %v62_v10 }
  0x2d   :  { %985 = vmatpush3.bf16.msra.mxu0 %v1165_v6  ;;  %v455_v60 = vrot.slane %v443_v56, 1  ;;  %v617_v61 = vrot.slane %v443_v56, 2 }
  0x2e   :  { %987 = vmatprep.subr.bf16.mxu0 %v1170_v11 }
  0x30   :  { %907 = vmatmul.mubr.msk.f32.vlgmr.msra.gmra.mrb[0].mxu0 %vm64_vm0, %v62_v10 }
  0x31   :  { %989 = vmatpush3.bf16.msra.mxu0 %v1170_v11  ;;  %917 = vmatprep.mubr.msk.f32.mxu0 %vm64_vm0, %v47_v7 }
  0x32   :  { %991 = vmatprep.subr.bf16.mxu0 %v1175_v14 }
  0x35   :  { %993 = vmatpush3.bf16.msra.mxu0 %v1175_v14 }
  0x36   :  { %995 = vmatprep.subr.bf16.mxu0 %v1181_v17 }
  0x38   :  { %918 = vmatmul.mubr.msk.f32.vlgmr.msra.gmra.mrb[0].mxu0 %vm64_vm0, %v47_v7 }
  0x39   :  { %997 = vmatpush3.bf16.msra.mxu0 %v1181_v17  ;;  %928 = vmatprep.mubr.msk.f32.mxu0 %vm64_vm0, %v227_v20 }
  0x3a   :  { %999 = vmatprep.subr.bf16.mxu0 %v1185_v21 }
  0x3d   :  { %1001 = vmatpush3.bf16.msra.mxu0 %v1185_v21 }
  0x3e   :  { %1030 = vmatprep.subr.bf16.mxu0 %v1110_v22 }
  0x40   :  { %929 = vmatmul.mubr.msk.f32.vlgmr.msra.gmra.mrb[0].mxu0 %vm64_vm0, %v227_v20 }
  0x41   :  { %975 = vmatprep.mubr.msk.f32.mxu0 %vm1111_vm1, %v1112_v23 }
 0x113   :  { %v930_v25 = vpop.f32.mrb[0].mxu0 }
 0x114   :  { %v318_v26 = vadd.f32 %v930_v25, %v1196_v24  ;;  %v299_v27 = vpop.f32.mrb[1].mxu0 }
 0x115   :  { %v317_v28 = vadd.f32 %v1196_v24, %v299_v27 }
 0x116   :  { %v322_v29 = vmin.f32 %v318_v26, 0.0  ;;  %vm320_vm2 = vcmp.gt.f32.partialorder %v318_v26, 0.0 }
 0x117   :  { %v321_v30 = vmin.f32 %v317_v28, 0.0  ;;  %vm319_vm3 = vcmp.gt.f32.partialorder %v317_v28, 0.0 }
 0x118   :  { %v325_v31 = vmul.f32 1.442695, %v322_v29 }
 0x119   :  { %v323_v32 = vmul.f32 1.442695, %v321_v30 }
 0x11a   :  { %1050 = vpow2.f32 %v325_v31  ;;  %v748_v31 = vld [vmem:[%s1257_s3] sm:$0x1f] }
 0x11b   :  { %1052 = vpow2.f32 %v323_v32 }
 0x124   :  { %v1051_v33 = vpop.eup %1050 }
 0x125   :  { %v1053_v34 = vpop.eup %1052  ;;  %v841_v35 = vadd.f32 -1.0, %v1051_v33 }
 0x126   :  { %v840_v36 = vadd.f32 -1.0, %v1053_v34 }
 0x127   :  { %v330_v37 = vsel %vm320_vm2, %v318_v26, %v841_v35 }
 0x128   :  { %v335_v38 = vrot.slane %v330_v37, 7  ;;  %v329_v39 = vsel %vm319_vm3, %v317_v28, %v840_v36  ;;  %v339_v41 = vrot.slane %v330_v37, 6 }
 0x129   :  { %v334_v40 = vrot.slane %v329_v39, 7 }
 0x12b   :  { %v336_v42 = vsel %vm333_vm4, %v334_v40, %v335_v38  ;;  %v341_v43 = vsel %vm333_vm4, %v329_v39, %v334_v40 }
 0x12c   :  { %v346_v44 = vrot.slane %v341_v43, 1  ;;  %v353_v45 = vrot.slane %v341_v43, 2  ;;  %v343_v46 = vsel %vm342_vm5, %v336_v42, %v339_v41 }
 0x12d   :  { %v347_v47 = vrot.slane %v343_v46, 1  ;;  %v354_v48 = vrot.slane %v343_v46, 2 }
 0x12f   :  { %v348_v49 = vsel %vm61_vm6, %v346_v44, %v347_v47  ;;  %v352_v50 = vmax.f32 %v343_v46, %v347_v47  ;;  %v355_v51 = vsel %vm226_vm7, %v353_v45, %v354_v48 }
 0x130   :  { %v351_v53 = vmax.f32 %v341_v43, %v348_v49 }
 0x131   :  { %v359_v54 = vmax.f32 %v352_v50, %v354_v48 }
 0x132   :  { %v358_v55 = vmax.f32 %v351_v53, %v355_v51 }
 0x134   :  { %v1003_v58 = vpack.c.bf16 %v359_v54, %v358_v55 }
 0x136   :  { %1005 = vmatpush3.bf16.msk.msra.mxu1 %vm1205_vm10, %v1003_v58 }
 0x137   :  { %1007 = vmatprep.subr.bf16.mxu1 %v1163_v3 }
 0x139   :  { %936 = vmatmul.mubr.msk.f32.vlgmr.msra.gmra.mrb[0].mxu1 %vm361_vm11, %v360_v59 }
 0x13a   :  { %1009 = vmatpush3.bf16.msra.mxu1 %v1163_v3  ;;  %946 = vmatprep.mubr.msk.f32.mxu1 %vm64_vm0, %v455_v60 }
 0x13b   :  { %1011 = vmatprep.subr.bf16.mxu1 %v1165_v6 }
 0x13e   :  { %1013 = vmatpush3.bf16.msra.mxu1 %v1165_v6 }
 0x13f   :  { %1015 = vmatprep.subr.bf16.mxu1 %v1170_v11 }
 0x141   :  { %947 = vmatmul.mubr.msk.f32.vlgmr.msra.gmra.mrb[2].mxu1 %vm64_vm0, %v455_v60 }
 0x142   :  { %1017 = vmatpush3.bf16.msra.mxu1 %v1170_v11  ;;  %957 = vmatprep.mubr.msk.f32.mxu1 %vm64_vm0, %v443_v56 }
 0x143   :  { %1019 = vmatprep.subr.bf16.mxu1 %v1175_v14 }
 0x146   :  { %1021 = vmatpush3.bf16.msra.mxu1 %v1175_v14 }
 0x147   :  { %1023 = vmatprep.subr.bf16.mxu1 %v1181_v17 }
 0x149   :  { %958 = vmatmul.mubr.msk.f32.vlgmr.msra.gmra.mrb[2].mxu1 %vm64_vm0, %v443_v56 }
 0x14a   :  { %1025 = vmatpush3.bf16.msra.mxu1 %v1181_v17  ;;  %968 = vmatprep.mubr.msk.f32.mxu1 %vm64_vm0, %v617_v61 }
 0x14b   :  { %1027 = vmatprep.subr.bf16.mxu1 %v1185_v21 }
 0x14e   :  { %1029 = vmatpush3.bf16.msra.mxu1 %v1185_v21 }
 0x151   :  { %969 = vmatmul.mubr.msk.f32.vlgmr.msra.gmra.mrb[2].mxu1 %vm64_vm0, %v617_v61 }
 0x20c   :  { %v434_v62 = vpop.f32.mrb[0].mxu1 }
 0x20d   :  { %439 = vst.msk [vmem:[%s1258_s4] sm:$0x1f] %vm438_vm12, %v434_v62  ;;  %v937_v63 = vpop.f32.mrb[1].mxu1 }
 0x224   :  { %v970_v0 = vpop.f32.mrb[2].mxu1 }
 0x225   :  { %v708_v1 = vadd.f32 %v970_v0, %v1196_v24  ;;  %v689_v2 = vpop.f32.mrb[3].mxu1 }
 0x226   :  { %v707_v3 = vadd.f32 %v1196_v24, %v689_v2 }
 0x227   :  { %v712_v4 = vmin.f32 %v708_v1, 0.0  ;;  %vm710_vm13 = vcmp.gt.f32.partialorder %v708_v1, 0.0 }
 0x228   :  { %v711_v5 = vmin.f32 %v707_v3, 0.0  ;;  %vm709_vm14 = vcmp.gt.f32.partialorder %v707_v3, 0.0 }
 0x229   :  { %v715_v6 = vmul.f32 1.442695, %v712_v4 }
 0x22a   :  { %v713_v7 = vmul.f32 1.442695, %v711_v5 }
 0x22b   :  { %1054 = vpow2.f32 %v715_v6 }
 0x22c   :  { %1056 = vpow2.f32 %v713_v7 }
 0x235   :  { %v1055_v8 = vpop.eup %1054 }
 0x236   :  { %v1057_v9 = vpop.eup %1056  ;;  %v852_v10 = vadd.f32 -1.0, %v1055_v8 }
 0x237   :  { %v851_v11 = vadd.f32 -1.0, %v1057_v9 }
 0x238   :  { %v720_v12 = vsel %vm710_vm13, %v708_v1, %v852_v10 }
 0x239   :  { %v724_v13 = vrot.slane %v720_v12, 7  ;;  %v719_v14 = vsel %vm709_vm14, %v707_v3, %v851_v11  ;;  %v728_v16 = vrot.slane %v720_v12, 6 }
 0x23a   :  { %v723_v15 = vrot.slane %v719_v14, 7 }
 0x23c   :  { %v725_v17 = vsel %vm333_vm4, %v723_v15, %v724_v13  ;;  %v730_v18 = vsel %vm333_vm4, %v719_v14, %v723_v15 }
 0x23d   :  { %v731_v19 = vsel %vm342_vm5, %v725_v17, %v728_v16  ;;  %v734_v20 = vrot.slane %v730_v18, 1  ;;  %v741_v21 = vrot.slane %v730_v18, 2 }
 0x23e   :  { %v735_v22 = vrot.slane %v731_v19, 1  ;;  %v742_v23 = vrot.slane %v731_v19, 2 }
 0x240   :  { %v736_v24 = vsel %vm61_vm6, %v734_v20, %v735_v22  ;;  %v740_v25 = vmax.f32 %v731_v19, %v735_v22  ;;  %v743_v26 = vsel %vm226_vm7, %v741_v21, %v742_v23 }
 0x241   :  { %v739_v27 = vmax.f32 %v730_v18, %v736_v24 }
 0x242   :  { %v747_v28 = vmax.f32 %v740_v25, %v742_v23 }
 0x243   :  { %v746_v29 = vmax.f32 %v739_v27, %v743_v26 }
 0x245   :  { %v1031_v30 = vpack.c.bf16 %v747_v28, %v746_v29 }
 0x247   :  { %1033 = vmatpush3.bf16.msk.msra.mxu0 %vm1205_vm10, %v1031_v30 }
 0x24a   :  { %976 = vmatmul.mubr.msk.f32.vlgmr.msra.gmra.mrb[2].mxu0 %vm361_vm11, %v748_v31 }
 0x31d   :  { %v821_v32 = vpop.f32.mrb[2].mxu0 }
 0x31e   :  { %855 = vst.msk [vmem:[%s1258_s4 + $0x8] sm:$0x1f] %vm438_vm12, %v821_v32  ;;  %v977_v33 = vpop.f32.mrb[3].mxu0 }
 0x31f   :  { %831 = vsyncpa [#allocation3], 1 }
 0x320   :  { %832 = vsyncpa [#allocation5], 1 }

</bundles_post_ra>
